<compile_context>
chip_gen: v6e
topology: v6e:2x2x1
jax: 0.10.0
libtpu: 0.0.40
codegen_flags: <defaults>
</compile_context>

<pallas_src>
import jax
import jax.numpy as jnp
from jax.experimental import pallas as pl
from jax.experimental.pallas import tpu as pltpu


# ---------------------------------------------------------------------------
# Kernel: one batch tile.  x:(TM,K)  w:(K,NP)  b:(1,NP)  ->  o:(TM,NP)
# ---------------------------------------------------------------------------
def _linear_kernel(x_ref, w_ref, b_ref, o_ref):
    acc = jnp.dot(x_ref[...], w_ref[...], preferred_element_type=jnp.float32)
    o_ref[...] = (acc + b_ref[...]).astype(o_ref.dtype)


# ---------------------------------------------------------------------------
# One-time parameter preparation (do this at param-creation time, NOT per call)
# ---------------------------------------------------------------------------
def prepare_params(weight, bias):
    """weight: (num_classes, input_size), bias: (num_classes,)  [PyTorch layout]

    Returns (w_t_pad, b_pad):
      w_t_pad: (input_size, NP) f32, NP = num_classes rounded up to 128
      b_pad:   (1, NP) f32, zero-padded
    """
    num_classes, input_size = weight.shape
    npad = ((num_classes + 127) // 128) * 128
    w_t = jnp.transpose(weight)                              # (K, num_classes)
    w_t_pad = jnp.zeros((input_size, npad), weight.dtype).at[:, :num_classes].set(w_t)
    b_pad = jnp.zeros((1, npad), bias.dtype).at[0, :num_classes].set(bias)
    return w_t_pad, b_pad


def _pick_tm(batch):
    # Big enough to amortize per-step overhead, small enough for v7x's VMEM.
    if batch <= 512:
        return batch          # block == full dim -> (8,128) rule satisfied
    return 512                # multiple of 8; boundary block is masked by Pallas


# ---------------------------------------------------------------------------
# Forward pass (Pallas path).
# NOTE: for tiny batches (e.g. < ~1k rows) a plain `x @ w_t_pad[:, :C] + b`
# is faster than any custom kernel; the Pallas path pays off at large batch.
# ---------------------------------------------------------------------------
def logistic_regression_forward(x, w_t_pad, b_pad, num_classes):
    """x: (batch, input_size) f32 -> logits: (batch, num_classes) f32."""
    batch, input_size = x.shape
    npad = w_t_pad.shape[1]
    tm = _pick_tm(batch)
    grid = (pl.cdiv(batch, tm),)

    # Rough VMEM budget: 2x double-buffered x/out tiles + resident W, b (f32).
    vmem_needed = 4 * (2 * (tm * input_size + tm * npad)
                       + 2 * (input_size * npad + npad))
    vmem_limit = max(32 * 1024 * 1024, min(2 * vmem_needed, 64 * 1024 * 1024))

    cost = pl.CostEstimate(
        flops=2 * batch * input_size * npad,
        transcendentals=0,
        bytes_accessed=4 * (batch * input_size + input_size * npad
                            + npad + batch * npad),
    )

    out_pad = pl.pallas_call(
        _linear_kernel,
        out_shape=jax.ShapeDtypeStruct((batch, npad), x.dtype),
        grid_spec=pltpu.PrefetchScalarGridSpec(
            num_scalar_prefetch=0,
            grid=grid,
            in_specs=[
                # x: tiled along batch, full K.
                pl.BlockSpec((tm, input_size), lambda i: (i, 0)),
                # W^T and bias: constant block -> stay VMEM-resident.
                pl.BlockSpec((input_size, npad), lambda i: (0, 0)),
                pl.BlockSpec((1, npad), lambda i: (0, 0)),
            ],
            out_specs=pl.BlockSpec((tm, npad), lambda i: (i, 0)),
        ),
        compiler_params=pltpu.CompilerParams(
            dimension_semantics=("parallel",),   # shards batch across v7x's 2 TCs
            vmem_limit_bytes=vmem_limit,
        ),
        cost_estimate=cost,
    )(x, w_t_pad, b_pad)

    # Drop the lane-padding columns (they carry zero-weight/zero-bias garbage).
    return out_pad[:, :num_classes]


# TODO(synk): train_model (CrossEntropyLoss + manual SGD-style update) is a host
# training loop, not a single forward op; only the forward pass is kernelized.


if __name__ == "__main__":
    # Small shapes implied by the module: batch=8, input_size=32, num_classes=10.
    batch, input_size, num_classes = 8, 32, 10

    key = jax.random.PRNGKey(0)
    kx, kw, kb = jax.random.split(key, 3)

    # Deterministic parameter init, mimicking nn.Linear (uniform +-1/sqrt(in)).
    bound = 1.0 / jnp.sqrt(jnp.float32(input_size))
    weight = jax.random.uniform(
        kw, (num_classes, input_size), jnp.float32, -bound, bound)
    bias = jax.random.uniform(
        kb, (num_classes,), jnp.float32, -bound, bound)

    x = jax.random.normal(kx, (batch, input_size), jnp.float32)

    # Hoisted, one-time parameter prep (pad + transpose).
    w_t_pad, b_pad = prepare_params(weight, bias)

    logits = logistic_regression_forward(x, w_t_pad, b_pad, num_classes)
    logits = jax.block_until_ready(logits)

    # Reference check against plain JAX (same math as nn.Linear).
    ref = x @ weight.T + bias
    assert logits.shape == (batch, num_classes)
    assert jnp.allclose(logits, ref, atol=1e-5, rtol=1e-5)

    print("KERNEL_OK")
</pallas_src>

<mosaic_0001>
module attributes {stable_mosaic.version = 11 : i64} {
  func.func @_linear_kernel(%arg0: i32, %arg1: memref<8x32xf32, #tpu.memory_space<vmem>>, %arg2: memref<32x128xf32, #tpu.memory_space<vmem>>, %arg3: memref<1x128xf32, #tpu.memory_space<vmem>>, %arg4: memref<8x128xf32, #tpu.memory_space<vmem>>) attributes {dimension_semantics = [#tpu.dimension_semantics<parallel>], iteration_bounds = array<i64: 1>, scalar_prefetch = 0 : i64, scratch_operands = 0 : i64, tpu.core_type = #tpu.core_type<tc>, window_params = [{transform_indices = @transform_0, window_bounds = array<i64: 8, 32>}, {pipeline_mode = #tpu.pipeline_mode<synchronous>, transform_indices = @transform_1, window_bounds = array<i64: 32, 128>}, {pipeline_mode = #tpu.pipeline_mode<synchronous>, transform_indices = @transform_2, window_bounds = array<i64: 1, 128>}, {transform_indices = @transform_3, window_bounds = array<i64: 8, 128>}]} {
    %c0 = arith.constant 0 : index
    %c0_0 = arith.constant 0 : index
    %0 = vector.load %arg1[%c0, %c0_0] : memref<8x32xf32, #tpu.memory_space<vmem>>, vector<8x32xf32>
    %c0_1 = arith.constant 0 : index
    %c0_2 = arith.constant 0 : index
    %1 = vector.load %arg2[%c0_1, %c0_2] : memref<32x128xf32, #tpu.memory_space<vmem>>, vector<32x128xf32>
    %cst = arith.constant dense<0.000000e+00> : vector<8x128xf32>
    %2 = tpu.matmul %0, %1, %cst {dimension_numbers = #tpu.dot_dimension_numbers<[1], [0], [0], [1], [0, 0, 1, 1], [], []>} : vector<8x32xf32>, vector<32x128xf32>, vector<8x128xf32> -> vector<8x128xf32>
    %c0_3 = arith.constant 0 : index
    %c0_4 = arith.constant 0 : index
    %3 = vector.load %arg3[%c0_3, %c0_4] : memref<1x128xf32, #tpu.memory_space<vmem>>, vector<1x128xf32>
    %4 = vector.broadcast %3 : vector<1x128xf32> to vector<8x128xf32>
    %5 = arith.addf %2, %4 : vector<8x128xf32>
    %c0_5 = arith.constant 0 : index
    %c0_6 = arith.constant 0 : index
    %6 = vector.load %arg4[%c0_5, %c0_6] : memref<8x128xf32, #tpu.memory_space<vmem>>, vector<8x128xf32>
    tpu.vector_store %arg4[%c0_5, %c0_6], %5 {strides = array<i32>} : memref<8x128xf32, #tpu.memory_space<vmem>>, vector<8x128xf32>,
    return
  }
  func.func @transform_0(%arg0: i32) -> (i32, i32) {
    %c0_i32 = arith.constant 0 : i32
    %c0_i32_0 = arith.constant 0 : i32
    return %arg0, %c0_i32 : i32, i32
  }
  func.func @transform_1(%arg0: i32) -> (i32, i32) {
    %c0_i32 = arith.constant 0 : i32
    %c0_i32_0 = arith.constant 0 : i32
    %c0_i32_1 = arith.constant 0 : i32
    return %c0_i32, %c0_i32_0 : i32, i32
  }
  func.func @transform_2(%arg0: i32) -> (i32, i32) {
    %c0_i32 = arith.constant 0 : i32
    %c0_i32_0 = arith.constant 0 : i32
    %c0_i32_1 = arith.constant 0 : i32
    return %c0_i32, %c0_i32_0 : i32, i32
  }
  func.func @transform_3(%arg0: i32) -> (i32, i32) {
    %c0_i32 = arith.constant 0 : i32
    %c0_i32_0 = arith.constant 0 : i32
    return %arg0, %c0_i32 : i32, i32
  }
}

</mosaic_0001>

<bundles_post_ra>
// kernel: tpu_custom_call.1
= control target key start
LH: loop header
LB: loop body
LE: loop exit
PB: predicated region body
PF: predicated region fallthrough
CT: control target
= control target key end

     0   :  { %8 = vsyncpa [#allocation3], 0  ;;  %s274_s0 = inlined_call_operand.hbm [shape: f32[8,32], index: 0, kind: input, shape index: {}]   ;;  %s275_s1 = inlined_call_operand.hbm [shape: f32[32,128], index: 1, kind: input, shape index: {}]   ;;  %s276_s2 = inlined_call_operand.vmem [shape: f32[1,128], index: 2, kind: input, shape index: {}]   ;;  %s277_s3 = inlined_call_operand.hbm [shape: f32[8,128], index: 3, kind: output, shape index: {}]  }
   0x1   :  { %9 = vsyncpa [#allocation6], 0 }
   0x2   :  { %10 = vsyncpa [#allocation4], 0  ;;  %s235_s12 = smov [#allocation2]   ;;  %s236_s14 = smov [#allocation5]  }
   0x3   :  { %s17_s13 = sshll.u32 %s235_s12, 4  ;;  %s26_s15 = sshll.u32 %s236_s14, 4  ;;  %s18_s13 = int_to_ptr.vmem [resolvable:$true] %s17_s13  ;;  %s27_s15 = int_to_ptr.vmem [resolvable:$true] %s26_s15 }
   0x4   :  { %s177_s16 = scalar_lea.vmem %s18_s13, 128  ;;  %p182_p1 = scmp.lt.s32.totalorder %s18_s13, %s18_s13 }
   0x5   :  { %p178_p0 = scmp.ne.s32.totalorder %s18_s13, %s177_s16  ;;  %p183_p2 = scmp.lt.s32.totalorder %s177_s16, %s177_s16 }
   0x7   :  { %p184_p3 = por %p183_p2, %p182_p1 }
   0x9   :  { %p185_p4 = pnand %p184_p3, %p178_p0 }
   0xb   :  { %188 = shalt.err (!%p185_p4)
}
   0xc   :  { %20 = dma.hbm_to_vmem [thread:$0]  %s274_s0, 128, %s18_s13, [#allocation3]  }
   0xd   :  { %s197_s19 = scalar_lea.vmem %s27_s15, 512  ;;  %p202_p6 = scmp.lt.s32.totalorder %s27_s15, %s27_s15 }
   0xe   :  { %p198_p5 = scmp.ne.s32.totalorder %s27_s15, %s197_s19  ;;  %p203_p7 = scmp.lt.s32.totalorder %s197_s19, %s197_s19 }
  0x10   :  { %p204_p8 = por %p203_p7, %p202_p6 }
  0x12   :  { %p205_p9 = pnand %p204_p8, %p198_p5 }
  0x14   :  { %208 = shalt.err (!%p205_p9)
}
  0x15   :  { %s237_s20 = smov 128   ;;  %s238_s21 = smov 8  }
  0x16   :  { %32 = dma.hbm_to_vmem [thread:$0]  %s275_s1, 512, %s27_s15, [#allocation6], %s237_s20, %s237_s20, %s238_s21  }
  0x17   :  { %229 = dma.done.wait [#allocation3], 128  }
  0x18   :  { %230 = vsyncadd [#allocation3], 4294967168 }
  0x19   :  { %231 = dma.done.wait [#allocation6], 512  }
  0x1a   :  { %232 = vsyncadd [#allocation6], 4294966784  ;;  %v239_v0 = vmov 0.0   ;;  %vm240_vm0 = vmmov 0   ;;  %v45_v1 = vld [vmem:[#allocation5 + $0x18] sm:$0xff]  ;;  %v44_v2 = vld [vmem:[#allocation5 + $0x10] sm:$0xff] }
  0x1b   :  { %151 = vmatprep.subr.mxu0 %v239_v0  ;;  %159 = vmatprep.mubr.msk.f32.mxu0 %vm240_vm0, %v239_v0  ;;  %v43_v3 = vld [vmem:[#allocation5 + $0x8] sm:$0xff]  ;;  %v42_v4 = vld [vmem:[#allocation5] sm:$0xff]  ;;  %v41_v5 = vld [vmem:[#allocation2] sm:$0xff]  ;;  %vm53_vm1 = vcmask 261120   ;;  %s241_s24 = smov [#allocation7]  }
  0x1c   :  { %152 = vmatpush3.msra.mxu0 %v45_v1  ;;  %v144_v6 = vld [vmem:[%s276_s2] ss:$0 sm:$0xff]  ;;  %s134_s25 = sshll.u32 %s241_s24, 4  ;;  %s135_s25 = int_to_ptr.vmem [resolvable:$true] %s134_s25 }
  0x1d   :  { %153 = vmatprep.subr.mxu0 %v239_v0  ;;  %s209_s26 = scalar_lea.vmem %s135_s25, 128  ;;  %p214_p11 = scmp.lt.s32.totalorder %s135_s25, %s135_s25 }
  0x1e   :  { %154 = vmatpush3.msra.mxu0 %v44_v2  ;;  %p210_p10 = scmp.ne.s32.totalorder %s135_s25, %s209_s26  ;;  %p215_p12 = scmp.lt.s32.totalorder %s209_s26, %s209_s26 }
  0x1f   :  { %155 = vmatprep.subr.mxu0 %v239_v0 }
  0x20   :  { %156 = vmatpush3.msra.mxu0 %v43_v3  ;;  %p216_p13 = por %p215_p12, %p214_p11 }
  0x21   :  { %157 = vmatprep.subr.mxu0 %v239_v0 }
  0x22   :  { %158 = vmatpush3.msra.mxu0 %v42_v4  ;;  %p217_p0 = pnand %p216_p13, %p210_p10 }
  0x23   :  { %160 = vmatmul.mubr.msk.f32.vlgmr.msra.gmra.mxu0 %vm53_vm1, %v41_v5 }
  0xe3   :  { %v123_v7 = vpop.f32.mrf.mxu0 }
  0xe4   :  { %v124_v8 = vadd.f32 %v144_v6, %v123_v7 }
  0xe5   :  { %v161_v9 = vpop.f32.mrf.mxu0 }
  0xe6   :  { %127 = vst [vmem:[#allocation7] sm:$0xff] %v124_v8 }
  0xe7   :  { %220 = shalt.err (!%p217_p0)
}
  0xe8   :  { %137 = dma.vmem_to_hbm [thread:$0]  %s135_s25, 128, %s277_s3, [#allocation4]  }
  0xe9   :  { %233 = dma.done.wait [#allocation4], 128  }
  0xea   :  { %234 = vsyncadd [#allocation4], 4294967168 }
  0xeb   :  { %141 = vsyncpa [#allocation3], 1 }
  0xec   :  { %142 = vsyncpa [#allocation6], 1 }
  0xed   :  { %143 = vsyncpa [#allocation4], 1 }

</bundles_post_ra>
